<compile_context>
chip_gen: v6e
topology: v6e:2x2x1
jax: 0.10.0
libtpu: 0.0.40
codegen_flags: <defaults>
</compile_context>

<pallas_src>
import functools

import jax
import jax.numpy as jnp
import numpy as np
from jax.experimental import pallas as pl
from jax.experimental.pallas import tpu as pltpu


def _round_up(x, m):
    return (x + m - 1) // m * m


def _nbytes(shape, dtype):
    return int(np.prod(shape)) * jnp.dtype(dtype).itemsize


def _choose_tile_n(n_rows, requested):
    """Token tile: sublane/MXU aligned; >= 4 grid steps when there is enough work."""
    cap = _round_up(n_rows, 8)                       # at most one sublane of slack
    t = max(8, min(requested, cap))
    if n_rows >= 1024:
        t = min(t, _round_up(pl.cdiv(n_rows, 4), 256))   # >=4 steps: v7x megacore + overlap
        t = max(256, (t // 256) * 256)                   # 256 = native MXU dim (v6e/v7x)
    elif t >= 16:
        t = min(_round_up(t, 16), cap)                   # bf16 sublane pack
    return t


def _self_output_kernel(x_ref, inp_ref, *rest, eps, hidden, fused, matmul_dtype):
    """One token tile of: dense -> kronecker adapter -> residual -> LayerNorm.

    x_ref   : (T, H)  tokens, caller dtype (cast to matmul_dtype in-kernel)
    inp_ref : (T, H)  residual input_tensor, caller dtype
    weights : (H, 2H) concatenated [Wd^T | Wd^T @ kron(B,A)]   (fused=True)
              or two (H, H) refs                                (fused=False)
    b2_ref  : (1, H)  b_dense @ kron(B, A)       (inside the relu)
    bpre_ref: (1, H)  b_dense + kron_bias        (outside the relu)
    gamma/beta: (1, H) LayerNorm affine
    o_ref   : (T, H)  output
    """
    if fused:
        wcat_ref, b2_ref, bpre_ref, gamma_ref, beta_ref, o_ref = rest
    else:
        wd_ref, w2_ref, b2_ref, bpre_ref, gamma_ref, beta_ref, o_ref = rest

    # In-kernel cast: no separate XLA cast pass over HBM in the wrapper.
    x = x_ref[...].astype(matmul_dtype)

    if fused:
        # Single MXU weight push per tile; lane-aligned split (H % 128 == 0).
        s = jnp.dot(x, wcat_ref[...], preferred_element_type=jnp.float32)   # (T, 2H)
        h = s[:, :hidden]
        k = s[:, hidden:] + b2_ref[...]
    else:
        # Both products depend only on x (dense bias folded through the Kron weight).
        h = jnp.dot(x, wd_ref[...], preferred_element_type=jnp.float32)
        k = jnp.dot(x, w2_ref[...], preferred_element_type=jnp.float32) + b2_ref[...]

    rep = jnp.maximum(k, 0.0)                                # relu (kron_bias in bpre)

    # adapter residual + BertSelfOutput residual, then LayerNorm -- f32 epilogue.
    y = h + rep + bpre_ref[...] + inp_ref[...].astype(jnp.float32)
    mean = jnp.mean(y, axis=-1, keepdims=True)
    var = jnp.mean(jnp.square(y - mean), axis=-1, keepdims=True)
    normed = (y - mean) * jax.lax.rsqrt(var + eps)
    o_ref[...] = (normed * gamma_ref[...] + beta_ref[...]).astype(o_ref.dtype)


def prepare_kronecker_adapter_params(params, matmul_dtype=jnp.bfloat16):
    """O(H^3) parameter glue, hoisted out of the per-call path (run once per checkpoint)."""
    H = params["dense_w"].shape[0]
    hi = jax.lax.Precision.HIGHEST
    wd_t = params["dense_w"].T.astype(jnp.float32)                          # (H, H)
    bd = params["dense_b"].reshape(1, H).astype(jnp.float32)                # (1, H)
    wk = jnp.kron(params["kron_B"].astype(jnp.float32),
                  params["kron_A"].astype(jnp.float32))                     # (H, H)
    w2 = jnp.dot(wd_t, wk, precision=hi)                                    # (H, H)
    b2 = jnp.dot(bd, wk, precision=hi)                                      # (1, H)
    bk = params["kron_bias"].reshape(1, H).astype(jnp.float32)

    fused = (H % 128 == 0)          # lane-aligned split -> single (H, 2H) matmul
    prepared = {
        "H": H,
        "fused": fused,
        "matmul_dtype": matmul_dtype,
        "b2": b2,                                   # inside the relu
        "bias_pre": bd + bk,                        # outside the relu (folded)
        "gamma": params["ln_gamma"].reshape(1, H).astype(jnp.float32),
        "beta": params["ln_beta"].reshape(1, H).astype(jnp.float32),
    }
    if fused:
        prepared["w_cat"] = jnp.concatenate([wd_t, w2], axis=1).astype(matmul_dtype)
    else:
        prepared["wd"] = wd_t.astype(matmul_dtype)
        prepared["w2"] = w2.astype(matmul_dtype)
    return prepared


def custom_adapter_bert_self_output(hidden_states, input_tensor, prepared, *,
                                    eps=1e-12, tile_n=1024, out_dtype=None):
    """hidden_states, input_tensor: (B, S, H); any float dtype (f32 or bf16)."""
    B, S, H = hidden_states.shape
    assert prepared["H"] == H
    N = B * S
    if out_dtype is None:
        out_dtype = hidden_states.dtype
    matmul_dtype = prepared["matmul_dtype"]
    fused = prepared["fused"]

    # Free reshapes (leading-dim merge is a metadata-only bitcast) -- no pad, no cast.
    x2d = hidden_states.reshape(N, H)
    inp2d = input_tensor.reshape(N, H)

    tile_n = _choose_tile_n(N, tile_n)
    grid_n = pl.cdiv(N, tile_n)                 # ragged last block masked by Pallas

    kernel = functools.partial(_self_output_kernel, eps=eps, hidden=H,
                               fused=fused, matmul_dtype=matmul_dtype)

    tok_spec = lambda: pl.BlockSpec((tile_n, H), lambda i: (i, 0))
    res_spec = lambda shape: pl.BlockSpec(shape, lambda i: (0, 0))   # VMEM-resident

    if fused:
        weight_args = [prepared["w_cat"]]
        weight_specs = [res_spec((H, 2 * H))]
    else:
        weight_args = [prepared["wd"], prepared["w2"]]
        weight_specs = [res_spec((H, H)), res_spec((H, H))]
    vec_args = [prepared["b2"], prepared["bias_pre"], prepared["gamma"], prepared["beta"]]
    vec_specs = [res_spec((1, H)) for _ in vec_args]

    # ---- VMEM footprint (double-buffered blocks) -> scoped-VMEM request -------------
    act_bytes = 2 * (_nbytes((tile_n, H), x2d.dtype)
                     + _nbytes((tile_n, H), inp2d.dtype)
                     + _nbytes((tile_n, H), out_dtype))
    w_bytes = 2 * sum(_nbytes(a.shape, a.dtype) for a in weight_args)
    vec_bytes = 2 * sum(_nbytes(a.shape, a.dtype) for a in vec_args)
    footprint = act_bytes + w_bytes + vec_bytes
    # Size from the real footprint + headroom; never claim all of v7x's 64 MiB.
    vmem_limit = int(min(max(footprint + (8 << 20), 32 << 20), 48 << 20))

    weight_elem_bytes = sum(_nbytes(a.shape, a.dtype) for a in weight_args)
    bytes_accessed = int(_nbytes((N, H), x2d.dtype)
                         + _nbytes((N, H), inp2d.dtype)
                         + _nbytes((N, H), out_dtype)
                         + weight_elem_bytes + 4 * H * 4)
    cost = pl.CostEstimate(flops=4 * N * H * H,      # two N x H x H matmuls
                           transcendentals=N,        # one rsqrt per token row
                           bytes_accessed=bytes_accessed)

    out2d = pl.pallas_call(
        kernel,
        out_shape=jax.ShapeDtypeStruct((N, H), out_dtype),
        grid=(grid_n,),
        in_specs=[tok_spec(), tok_spec()] + weight_specs + vec_specs,
        out_specs=tok_spec(),
        compiler_params=pltpu.CompilerParams(
            dimension_semantics=("parallel",),       # megacore split on v7x
            vmem_limit_bytes=vmem_limit,
        ),
        cost_estimate=cost,
    )(x2d, inp2d, *weight_args, *vec_args)

    return out2d.reshape(B, S, H)


def _reference(hidden_states, input_tensor, params, eps=1e-12):
    hi = jax.lax.Precision.HIGHEST
    h = jnp.matmul(hidden_states, params["dense_w"].T, precision=hi) + params["dense_b"]
    wk = jnp.kron(params["kron_B"], params["kron_A"])
    rep = jnp.maximum(jnp.matmul(h, wk, precision=hi), 0.0) + params["kron_bias"]
    a = h + rep
    y = a + input_tensor
    mean = jnp.mean(y, axis=-1, keepdims=True)
    var = jnp.mean(jnp.square(y - mean), axis=-1, keepdims=True)
    normed = (y - mean) / jnp.sqrt(var + eps)
    return normed * params["ln_gamma"] + params["ln_beta"]


if __name__ == "__main__":
    key = jax.random.PRNGKey(0)
    keys = jax.random.split(key, 10)

    def make_params(H, r, k0):
        ks = jax.random.split(k0, 5)
        # Nonzero synthetic values (unlike the module's zero-init Kronecker factors)
        # so every code path in the kernel is actually exercised.
        return {
            "dense_w": jax.random.normal(ks[0], (H, H), jnp.float32) * 0.05,
            "dense_b": jax.random.normal(ks[1], (H,), jnp.float32) * 0.05,
            "kron_A": jax.random.normal(ks[2], (r[0], r[1]), jnp.float32) * 0.02,
            "kron_B": jax.random.normal(ks[3], (H // r[0], H // r[1]), jnp.float32) * 0.02,
            "kron_bias": jax.random.normal(ks[4], (H,), jnp.float32) * 0.01,
            "ln_gamma": jnp.ones((H,), jnp.float32),
            "ln_beta": jnp.zeros((H,), jnp.float32),
        }

    # Small config consistent with the module: hidden_size=32, r=[4, 4], batch=2, seq=8.
    B, S, H = 2, 8, 32
    params = make_params(H, (4, 4), keys[0])
    hs = jax.random.normal(keys[1], (B, S, H), jnp.float32)
    it = jax.random.normal(keys[2], (B, S, H), jnp.float32)
    ref = _reference(hs, it, params)

    # Parameter glue hoisted out of the forward path: done once per checkpoint.
    prep_f32 = prepare_kronecker_adapter_params(params, matmul_dtype=jnp.float32)
    prep_bf16 = prepare_kronecker_adapter_params(params, matmul_dtype=jnp.bfloat16)

    # 1) f32 matmul path: tight check of the fused semantics (only f32 reassociation).
    out = jax.block_until_ready(custom_adapter_bert_self_output(hs, it, prep_f32))
    np.testing.assert_allclose(np.asarray(out), np.asarray(ref), rtol=5e-4, atol=5e-4)

    # 2) bf16 matmul fast path: MXU-native operands, f32 accumulation/epilogue.
    out = jax.block_until_ready(custom_adapter_bert_self_output(hs, it, prep_bf16))
    np.testing.assert_allclose(np.asarray(out), np.asarray(ref), rtol=2e-2, atol=2e-2)

    # 3) Ragged token count: N=200, tile_n=64 -> grid=(4,), partial last block is
    #    masked by Pallas (no wrapper-side pad / output slice).
    B2, S2 = 2, 100
    hs2 = jax.random.normal(keys[3], (B2, S2, H), jnp.float32)
    it2 = jax.random.normal(keys[4], (B2, S2, H), jnp.float32)
    out2 = jax.block_until_ready(
        custom_adapter_bert_self_output(hs2, it2, prep_f32, tile_n=64))
    np.testing.assert_allclose(np.asarray(out2),
                               np.asarray(_reference(hs2, it2, params)),
                               rtol=5e-4, atol=5e-4)

    # 4) Lane-aligned H (multiple of 128): concatenated (H, 2H) single-matmul path,
    #    bf16 activations in / bf16 out (bytes-minimal, no wrapper casts).
    H3 = 128
    params3 = make_params(H3, (4, 4), keys[5])
    prep3 = prepare_kronecker_adapter_params(params3)            # bf16, fused weight
    hs3 = (jax.random.normal(keys[6], (B, S, H3), jnp.float32)).astype(jnp.bfloat16)
    it3 = (jax.random.normal(keys[7], (B, S, H3), jnp.float32)).astype(jnp.bfloat16)
    out3 = jax.block_until_ready(custom_adapter_bert_self_output(hs3, it3, prep3))
    ref3 = _reference(hs3.astype(jnp.float32), it3.astype(jnp.float32), params3)
    np.testing.assert_allclose(np.asarray(out3.astype(jnp.float32)), np.asarray(ref3),
                               rtol=3e-2, atol=3e-2)

    print("KERNEL_OK")
</pallas_src>

<mosaic_0001>
module attributes {stable_mosaic.version = 11 : i64} {
  func.func @_self_output_kernel(%arg0: i32, %arg1: memref<16x32xf32, #tpu.memory_space<vmem>>, %arg2: memref<16x32xf32, #tpu.memory_space<vmem>>, %arg3: memref<32x32xf32, #tpu.memory_space<vmem>>, %arg4: memref<32x32xf32, #tpu.memory_space<vmem>>, %arg5: memref<1x32xf32, #tpu.memory_space<vmem>>, %arg6: memref<1x32xf32, #tpu.memory_space<vmem>>, %arg7: memref<1x32xf32, #tpu.memory_space<vmem>>, %arg8: memref<1x32xf32, #tpu.memory_space<vmem>>, %arg9: memref<16x32xf32, #tpu.memory_space<vmem>>) attributes {dimension_semantics = [#tpu.dimension_semantics<parallel>], iteration_bounds = array<i64: 1>, scalar_prefetch = 0 : i64, scratch_operands = 0 : i64, tpu.core_type = #tpu.core_type<tc>, window_params = [{transform_indices = @transform_0, window_bounds = array<i64: 16, 32>}, {transform_indices = @transform_1, window_bounds = array<i64: 16, 32>}, {pipeline_mode = #tpu.pipeline_mode<synchronous>, transform_indices = @transform_2, window_bounds = array<i64: 32, 32>}, {pipeline_mode = #tpu.pipeline_mode<synchronous>, transform_indices = @transform_3, window_bounds = array<i64: 32, 32>}, {pipeline_mode = #tpu.pipeline_mode<synchronous>, transform_indices = @transform_4, window_bounds = array<i64: 1, 32>}, {pipeline_mode = #tpu.pipeline_mode<synchronous>, transform_indices = @transform_5, window_bounds = array<i64: 1, 32>}, {pipeline_mode = #tpu.pipeline_mode<synchronous>, transform_indices = @transform_6, window_bounds = array<i64: 1, 32>}, {pipeline_mode = #tpu.pipeline_mode<synchronous>, transform_indices = @transform_7, window_bounds = array<i64: 1, 32>}, {transform_indices = @transform_8, window_bounds = array<i64: 16, 32>}]} {
    %c0 = arith.constant 0 : index
    %c0_0 = arith.constant 0 : index
    %0 = vector.load %arg1[%c0, %c0_0] : memref<16x32xf32, #tpu.memory_space<vmem>>, vector<16x32xf32>
    %c0_1 = arith.constant 0 : index
    %c0_2 = arith.constant 0 : index
    %1 = vector.load %arg3[%c0_1, %c0_2] : memref<32x32xf32, #tpu.memory_space<vmem>>, vector<32x32xf32>
    %cst = arith.constant dense<0.000000e+00> : vector<16x32xf32>
    %2 = tpu.matmul %0, %1, %cst {dimension_numbers = #tpu.dot_dimension_numbers<[1], [0], [0], [1], [0, 0, 1, 1], [], []>} : vector<16x32xf32>, vector<32x32xf32>, vector<16x32xf32> -> vector<16x32xf32>
    %c0_3 = arith.constant 0 : index
    %c0_4 = arith.constant 0 : index
    %3 = vector.load %arg4[%c0_3, %c0_4] : memref<32x32xf32, #tpu.memory_space<vmem>>, vector<32x32xf32>
    %cst_5 = arith.constant dense<0.000000e+00> : vector<16x32xf32>
    %4 = tpu.matmul %0, %3, %cst_5 {dimension_numbers = #tpu.dot_dimension_numbers<[1], [0], [0], [1], [0, 0, 1, 1], [], []>} : vector<16x32xf32>, vector<32x32xf32>, vector<16x32xf32> -> vector<16x32xf32>
    %c0_6 = arith.constant 0 : index
    %c0_7 = arith.constant 0 : index
    %5 = vector.load %arg5[%c0_6, %c0_7] : memref<1x32xf32, #tpu.memory_space<vmem>>, vector<1x32xf32>
    %6 = vector.broadcast %5 : vector<1x32xf32> to vector<16x32xf32>
    %7 = arith.addf %4, %6 : vector<16x32xf32>
    %cst_8 = arith.constant 0.000000e+00 : f32
    %8 = vector.broadcast %cst_8 : f32 to vector<16x32xf32>
    %9 = arith.maximumf %7, %8 : vector<16x32xf32>
    %10 = arith.addf %2, %9 : vector<16x32xf32>
    %c0_9 = arith.constant 0 : index
    %c0_10 = arith.constant 0 : index
    %11 = vector.load %arg6[%c0_9, %c0_10] : memref<1x32xf32, #tpu.memory_space<vmem>>, vector<1x32xf32>
    %12 = vector.broadcast %11 : vector<1x32xf32> to vector<16x32xf32>
    %13 = arith.addf %10, %12 : vector<16x32xf32>
    %c0_11 = arith.constant 0 : index
    %c0_12 = arith.constant 0 : index
    %14 = vector.load %arg2[%c0_11, %c0_12] : memref<16x32xf32, #tpu.memory_space<vmem>>, vector<16x32xf32>
    %15 = arith.addf %13, %14 : vector<16x32xf32>
    %cst_13 = arith.constant dense<0.000000e+00> : vector<16xf32>
    %16 = vector.multi_reduction <add>, %15, %cst_13 [1] : vector<16x32xf32> to vector<16xf32>
    %17 = vector.shape_cast %16 : vector<16xf32> to vector<16x1xf32>
    %cst_14 = arith.constant 3.200000e+01 : f32
    %18 = vector.broadcast %cst_14 : f32 to vector<16x1xf32>
    %19 = arith.divf %17, %18 : vector<16x1xf32>
    %20 = vector.broadcast %19 : vector<16x1xf32> to vector<16x32xf32>
    %21 = arith.subf %15, %20 : vector<16x32xf32>
    %22 = arith.mulf %21, %21 : vector<16x32xf32>
    %cst_15 = arith.constant dense<0.000000e+00> : vector<16xf32>
    %23 = vector.multi_reduction <add>, %22, %cst_15 [1] : vector<16x32xf32> to vector<16xf32>
    %24 = vector.shape_cast %23 : vector<16xf32> to vector<16x1xf32>
    %cst_16 = arith.constant 3.200000e+01 : f32
    %25 = vector.broadcast %cst_16 : f32 to vector<16x1xf32>
    %26 = arith.divf %24, %25 : vector<16x1xf32>
    %27 = vector.broadcast %19 : vector<16x1xf32> to vector<16x32xf32>
    %28 = arith.subf %15, %27 : vector<16x32xf32>
    %cst_17 = arith.constant 9.99999996E-13 : f32
    %29 = vector.broadcast %cst_17 : f32 to vector<16x1xf32>
    %30 = arith.addf %26, %29 : vector<16x1xf32>
    %31 = math.rsqrt %30 : vector<16x1xf32>
    %32 = vector.broadcast %31 : vector<16x1xf32> to vector<16x32xf32>
    %33 = arith.mulf %28, %32 : vector<16x32xf32>
    %c0_18 = arith.constant 0 : index
    %c0_19 = arith.constant 0 : index
    %34 = vector.load %arg7[%c0_18, %c0_19] : memref<1x32xf32, #tpu.memory_space<vmem>>, vector<1x32xf32>
    %35 = vector.broadcast %34 : vector<1x32xf32> to vector<16x32xf32>
    %36 = arith.mulf %33, %35 : vector<16x32xf32>
    %c0_20 = arith.constant 0 : index
    %c0_21 = arith.constant 0 : index
    %37 = vector.load %arg8[%c0_20, %c0_21] : memref<1x32xf32, #tpu.memory_space<vmem>>, vector<1x32xf32>
    %38 = vector.broadcast %37 : vector<1x32xf32> to vector<16x32xf32>
    %39 = arith.addf %36, %38 : vector<16x32xf32>
    %c0_22 = arith.constant 0 : index
    %c0_23 = arith.constant 0 : index
    %40 = vector.load %arg9[%c0_22, %c0_23] : memref<16x32xf32, #tpu.memory_space<vmem>>, vector<16x32xf32>
    tpu.vector_store %arg9[%c0_22, %c0_23], %39 {strides = array<i32>} : memref<16x32xf32, #tpu.memory_space<vmem>>, vector<16x32xf32>,
    return
  }
  func.func @transform_0(%arg0: i32) -> (i32, i32) {
    %c0_i32 = arith.constant 0 : i32
    %c0_i32_0 = arith.constant 0 : i32
    return %arg0, %c0_i32 : i32, i32
  }
  func.func @transform_1(%arg0: i32) -> (i32, i32) {
    %c0_i32 = arith.constant 0 : i32
    %c0_i32_0 = arith.constant 0 : i32
    return %arg0, %c0_i32 : i32, i32
  }
  func.func @transform_2(%arg0: i32) -> (i32, i32) {
    %c0_i32 = arith.constant 0 : i32
    %c0_i32_0 = arith.constant 0 : i32
    %c0_i32_1 = arith.constant 0 : i32
    return %c0_i32, %c0_i32_0 : i32, i32
  }
  func.func @transform_3(%arg0: i32) -> (i32, i32) {
    %c0_i32 = arith.constant 0 : i32
    %c0_i32_0 = arith.constant 0 : i32
    %c0_i32_1 = arith.constant 0 : i32
    return %c0_i32, %c0_i32_0 : i32, i32
  }
  func.func @transform_4(%arg0: i32) -> (i32, i32) {
    %c0_i32 = arith.constant 0 : i32
    %c0_i32_0 = arith.constant 0 : i32
    %c0_i32_1 = arith.constant 0 : i32
    return %c0_i32, %c0_i32_0 : i32, i32
  }
  func.func @transform_5(%arg0: i32) -> (i32, i32) {
    %c0_i32 = arith.constant 0 : i32
    %c0_i32_0 = arith.constant 0 : i32
    %c0_i32_1 = arith.constant 0 : i32
    return %c0_i32, %c0_i32_0 : i32, i32
  }
  func.func @transform_6(%arg0: i32) -> (i32, i32) {
    %c0_i32 = arith.constant 0 : i32
    %c0_i32_0 = arith.constant 0 : i32
    %c0_i32_1 = arith.constant 0 : i32
    return %c0_i32, %c0_i32_0 : i32, i32
  }
  func.func @transform_7(%arg0: i32) -> (i32, i32) {
    %c0_i32 = arith.constant 0 : i32
    %c0_i32_0 = arith.constant 0 : i32
    %c0_i32_1 = arith.constant 0 : i32
    return %c0_i32, %c0_i32_0 : i32, i32
  }
  func.func @transform_8(%arg0: i32) -> (i32, i32) {
    %c0_i32 = arith.constant 0 : i32
    %c0_i32_0 = arith.constant 0 : i32
    return %arg0, %c0_i32 : i32, i32
  }
}

</mosaic_0001>

<bundles_post_ra>
// kernel: tpu_custom_call.1
= control target key start
LH: loop header
LB: loop body
LE: loop exit
PB: predicated region body
PF: predicated region fallthrough
CT: control target
= control target key end

     0   :  { %13 = vsyncpa [#allocation3], 0  ;;  %s605_s0 = inlined_call_operand.hbm [shape: f32[16,32], index: 0, kind: input, shape index: {}]   ;;  %s606_s1 = inlined_call_operand.hbm [shape: f32[16,32], index: 1, kind: input, shape index: {}]   ;;  %s607_s2 = inlined_call_operand.hbm [shape: f32[32,32], index: 2, kind: input, shape index: {}]   ;;  %s608_s3 = inlined_call_operand.hbm [shape: f32[32,32], index: 3, kind: input, shape index: {}]   ;;  %s609_s4 = inlined_call_operand.vmem [shape: f32[1,32], index: 4, kind: input, shape index: {}]   ;;  %s610_s5 = inlined_call_operand.vmem [shape: f32[1,32], index: 5, kind: input, shape index: {}]   ;;  %s611_s6 = inlined_call_operand.vmem [shape: f32[1,32], index: 6, kind: input, shape index: {}]   ;;  %s612_s7 = inlined_call_operand.vmem [shape: f32[1,32], index: 7, kind: input, shape index: {}]   ;;  %s613_s8 = inlined_call_operand.hbm [shape: f32[16,32], index: 8, kind: output, shape index: {}]  }
   0x1   :  { %14 = vsyncpa [#allocation6], 0 }
   0x2   :  { %15 = vsyncpa [#allocation9], 0 }
   0x3   :  { %16 = vsyncpa [#allocation4], 0  ;;  %s501_s27 = smov [#allocation5]   ;;  %s502_s29 = smov [#allocation2]  }
   0x4   :  { %s34_s28 = sshll.u32 %s501_s27, 4  ;;  %s22_s30 = sshll.u32 %s502_s29, 4  ;;  %s35_s28 = int_to_ptr.vmem [resolvable:$true] %s34_s28  ;;  %s23_s30 = int_to_ptr.vmem [resolvable:$true] %s22_s30 }
   0x5   :  { %s401_s9 = scalar_lea.vmem %s35_s28, 256  ;;  %p406_p1 = scmp.lt.s32.totalorder %s35_s28, %s35_s28 }
   0x6   :  { %p402_p0 = scmp.ne.s32.totalorder %s35_s28, %s401_s9  ;;  %p407_p2 = scmp.lt.s32.totalorder %s401_s9, %s401_s9 }
   0x8   :  { %p408_p3 = por %p407_p2, %p406_p1 }
   0xa   :  { %p409_p4 = pnand %p408_p3, %p402_p0 }
   0xc   :  { %412 = shalt.err (!%p409_p4)
}
   0xd   :  { %s503_s10 = smov 128   ;;  %s504_s11 = smov 8  }
   0xe   :  { %40 = dma.hbm_to_vmem [thread:$0]  %s606_s1, 256, %s35_s28, [#allocation6], %s503_s10, %s503_s10, %s504_s11  }
   0xf   :  { %s421_s14 = scalar_lea.vmem %s23_s30, 256  ;;  %p426_p6 = scmp.lt.s32.totalorder %s23_s30, %s23_s30 }
  0x10   :  { %p422_p5 = scmp.ne.s32.totalorder %s23_s30, %s421_s14  ;;  %p427_p7 = scmp.lt.s32.totalorder %s421_s14, %s421_s14 }
  0x12   :  { %p428_p8 = por %p427_p7, %p426_p6 }
  0x14   :  { %p429_p9 = pnand %p428_p8, %p422_p5 }
  0x16   :  { %432 = shalt.err (!%p429_p9)
}
  0x17   :  { %28 = dma.hbm_to_vmem [thread:$0]  %s605_s0, 256, %s23_s30, [#allocation3], %s503_s10, %s503_s10, %s504_s11  }
  0x18   :  { %s505_s17 = smov [#allocation7]   ;;  %s506_s19 = smov [#allocation8]  }
  0x19   :  { %s46_s18 = sshll.u32 %s505_s17, 4  ;;  %s58_s20 = sshll.u32 %s506_s19, 4  ;;  %s47_s18 = int_to_ptr.vmem [resolvable:$true] %s46_s18  ;;  %s59_s20 = int_to_ptr.vmem [resolvable:$true] %s58_s20 }
  0x1a   :  { %s441_s1 = scalar_lea.vmem %s47_s18, 512  ;;  %p446_p11 = scmp.lt.s32.totalorder %s47_s18, %s47_s18 }
  0x1b   :  { %p442_p10 = scmp.ne.s32.totalorder %s47_s18, %s441_s1  ;;  %p447_p12 = scmp.lt.s32.totalorder %s441_s1, %s441_s1 }
  0x1d   :  { %p448_p13 = por %p447_p12, %p446_p11 }
  0x1f   :  { %p449_p0 = pnand %p448_p13, %p442_p10 }
  0x21   :  { %452 = shalt.err (!%p449_p0)
}
  0x22   :  { %52 = dma.hbm_to_vmem [thread:$0]  %s607_s2, 512, %s47_s18, [#allocation6], %s503_s10, %s503_s10, %s504_s11  }
  0x23   :  { %s461_s0 = scalar_lea.vmem %s59_s20, 512  ;;  %p466_p2 = scmp.lt.s32.totalorder %s59_s20, %s59_s20 }
  0x24   :  { %p462_p1 = scmp.ne.s32.totalorder %s59_s20, %s461_s0  ;;  %p467_p3 = scmp.lt.s32.totalorder %s461_s0, %s461_s0 }
  0x26   :  { %p468_p4 = por %p467_p3, %p466_p2 }
  0x28   :  { %p469_p5 = pnand %p468_p4, %p462_p1 }
  0x2a   :  { %472 = shalt.err (!%p469_p5)
}
  0x2b   :  { %64 = dma.hbm_to_vmem [thread:$0]  %s608_s3, 512, %s59_s20, [#allocation9], %s503_s10, %s503_s10, %s504_s11  }
  0x2c   :  { %493 = dma.done.wait [#allocation3], 256  }
  0x2d   :  { %494 = vsyncadd [#allocation3], 4294967040 }
  0x2e   :  { %495 = dma.done.wait [#allocation6], 768  }
  0x2f   :  { %496 = vsyncadd [#allocation6], 4294966528 }
  0x30   :  { %497 = dma.done.wait [#allocation9], 512  }
  0x31   :  { %498 = vsyncadd [#allocation9], 4294966784  ;;  %v94_v0 = vld [vmem:[#allocation8 + $0x18] sm:$0xff]  ;;  %v93_v1 = vld [vmem:[#allocation8 + $0x10] sm:$0xff]  ;;  %vm102_vm0 = vcmask 261120   ;;  %s507_s29 = smov [#allocation10]  }
  0x32   :  { %v90_v2 = vld [vmem:[#allocation7 + $0x18] sm:$0xff]  ;;  %360 = vmatprep.subr.mxu0 %v94_v0  ;;  %v89_v3 = vld [vmem:[#allocation7 + $0x10] sm:$0xff]  ;;  %v92_v4 = vld [vmem:[#allocation8 + $0x8] sm:$0xff]  ;;  %s326_s30 = sshll.u32 %s507_s29, 4  ;;  %s327_s30 = int_to_ptr.vmem [resolvable:$true] %s326_s30 }
  0x33   :  { %371 = vmatprep.subr.mxu1 %v90_v2  ;;  %361 = vmatpush3.msra.mxu0 %v94_v0  ;;  %v88_v5 = vld [vmem:[#allocation7 + $0x8] sm:$0xff]  ;;  %v85_v6 = vld [vmem:[#allocation2] sm:$0xff]  ;;  %v270_v22 = vld [vmem:[#allocation5] sm:$0xff]  ;;  %s473_s9 = scalar_lea.vmem %s327_s30, 256  ;;  %p478_p7 = scmp.lt.s32.totalorder %s327_s30, %s327_s30 }
  0x34   :  { %372 = vmatpush3.msra.mxu1 %v90_v2  ;;  %362 = vmatprep.subr.mxu0 %v93_v1  ;;  %v91_v7 = vld [vmem:[#allocation8] sm:$0xff]  ;;  %v86_v9 = vld [vmem:[#allocation2 + $0x8] sm:$0xff]  ;;  %v271_v25 = vld [vmem:[#allocation5 + $0x8] sm:$0xff]  ;;  %p474_p6 = scmp.ne.s32.totalorder %s327_s30, %s473_s9  ;;  %p479_p8 = scmp.lt.s32.totalorder %s473_s9, %s473_s9 }
  0x35   :  { %373 = vmatprep.subr.mxu1 %v89_v3  ;;  %363 = vmatpush3.msra.mxu0 %v93_v1  ;;  %v87_v8 = vld [vmem:[#allocation7] sm:$0xff] }
  0x36   :  { %374 = vmatpush3.msra.mxu1 %v89_v3  ;;  %364 = vmatprep.subr.mxu0 %v92_v4  ;;  %v340_v10 = vld [vmem:[%s609_s4] ss:$0 sm:$0xff]  ;;  %p480_p9 = por %p479_p8, %p478_p7 }
  0x37   :  { %375 = vmatprep.subr.mxu1 %v88_v5  ;;  %365 = vmatpush3.msra.mxu0 %v92_v4  ;;  %v345_v19 = vld [vmem:[%s610_s5] ss:$0 sm:$0xff] }
  0x38   :  { %368 = vmatprep.mubr.msk.f32.mxu0 %vm102_vm0, %v85_v6  ;;  %366 = vmatprep.subr.mxu0 %v91_v7  ;;  %v346_v47 = vld [vmem:[%s611_s6] ss:$0 sm:$0xff]  ;;  %p481_p10 = pnand %p480_p9, %p474_p6 }
  0x39   :  { %376 = vmatpush3.msra.mxu1 %v88_v5  ;;  %367 = vmatpush3.msra.mxu0 %v91_v7  ;;  %v347_v49 = vld [vmem:[%s612_s7] ss:$0 sm:$0xff] }
  0x3a   :  { %377 = vmatprep.subr.mxu1 %v87_v8  ;;  %369 = vmatmul.mubr.msk.f32.vlgmr.msra.gmra.mxu0 %vm102_vm0, %v86_v9 }
  0x3b   :  { %378 = vmatpush3.msra.mxu1 %v87_v8  ;;  %379 = vmatprep.mubr.msk.f32.mxu1 %vm102_vm0, %v85_v6 }
  0x3c   :  { %380 = vmatmul.mubr.msk.f32.vlgmr.msra.gmra.mxu1 %vm102_vm0, %v86_v9 }
  0xfa   :  { %v370_v11 = vpop.f32.mrf.mxu0 }
  0xfb   :  { %v181_v12 = vadd.f32 %v370_v11, %v340_v10 }
  0xfc   :  { %v175_v13 = vpop.f32.mrf.mxu0  ;;  %v381_v14 = vpop.f32.mrf.mxu1 }
  0xfd   :  { %v185_v15 = vmax.f32 %v181_v12, 0.0  ;;  %v176_v16 = vadd.f32 %v340_v10, %v175_v13 }
  0xfe   :  { %v252_v20 = vpop.f32.mrf.mxu1 }
  0xff   :  { %v184_v17 = vmax.f32 %v176_v16, 0.0  ;;  %v258_v18 = vadd.f32 %v381_v14, %v185_v15 }
 0x101   :  { %v253_v21 = vadd.f32 %v252_v20, %v184_v17  ;;  %v269_v23 = vadd.f32 %v345_v19, %v258_v18 }
 0x103   :  { %v268_v24 = vadd.f32 %v345_v19, %v253_v21  ;;  %v273_v28 = vadd.f32 %v271_v25, %v269_v23 }
 0x105   :  { %v272_v26 = vadd.f32 %v270_v22, %v268_v24  ;;  %v277_v29 = vsel %vm102_vm0, %v273_v28, 0.0 }
 0x107   :  { %v274_v27 = vsel %vm102_vm0, %v272_v26, 0.0 }
 0x108   :  { %275 = vadd.xlane.f32.xlu0 %v274_v27 }
 0x10c   :  { %278 = vadd.xlane.f32.xlu0 %v277_v29 }
 0x191   :  { %v276_v30 = vpop.xlane.xlu0 %275 }
 0x192   :  { %v281_v31 = vmul.f32 0.03125, %v276_v30 }
 0x194   :  { %v283_v32 = vsub.f32 %v272_v26, %v281_v31 }
 0x195   :  { %v279_v33 = vpop.xlane.xlu0 %278 }
 0x196   :  { %v282_v34 = vmul.f32 0.03125, %v279_v33  ;;  %v285_v35 = vmul.f32 %v283_v32, %v283_v32 }
 0x198   :  { %v284_v36 = vsub.f32 %v273_v28, %v282_v34  ;;  %v287_v37 = vsel %vm102_vm0, %v285_v35, 0.0 }
 0x199   :  { %288 = vadd.xlane.f32.xlu1 %v287_v37 }
 0x19a   :  { %v286_v38 = vmul.f32 %v284_v36, %v284_v36 }
 0x19c   :  { %v290_v39 = vsel %vm102_vm0, %v286_v38, 0.0 }
 0x19d   :  { %291 = vadd.xlane.f32.xlu1 %v290_v39 }
 0x222   :  { %v289_v40 = vpop.xlane.xlu1 %288 }
 0x223   :  { %v293_v41 = vmul.f32 0.03125, %v289_v40 }
 0x225   :  { %v295_v42 = vadd.f32 1e-12, %v293_v41 }
 0x226   :  { %v292_v43 = vpop.xlane.xlu1 %291 }
 0x227   :  { %389 = vrsqrt.f32 %v295_v42  ;;  %v294_v44 = vmul.f32 0.03125, %v292_v43 }
 0x229   :  { %v296_v45 = vadd.f32 1e-12, %v294_v44 }
 0x22b   :  { %391 = vrsqrt.f32 %v296_v45 }
 0x234   :  { %v390_v46 = vpop.eup %389 }
 0x235   :  { %v299_v48 = vmul.f32 %v390_v46, %v283_v32 }
 0x237   :  { %v308_v50 = vmul.f32 %v346_v47, %v299_v48 }
 0x238   :  { %v392_v51 = vpop.eup %391 }
 0x239   :  { %v300_v52 = vmul.f32 %v392_v51, %v284_v36  ;;  %v317_v53 = vadd.f32 %v347_v49, %v308_v50 }
 0x23b   :  { %v309_v54 = vmul.f32 %v346_v47, %v300_v52  ;;  %319 = vst.msk [vmem:[#allocation10] sm:$0xff] %vm102_vm0, %v317_v53 }
 0x23d   :  { %v318_v55 = vadd.f32 %v347_v49, %v309_v54 }
 0x23f   :  { %320 = vst.msk [vmem:[#allocation10 + $0x8] sm:$0xff] %vm102_vm0, %v318_v55 }
 0x240   :  { %484 = shalt.err (!%p481_p10)
}
 0x241   :  { %332 = dma.vmem_to_hbm [thread:$0]  %s327_s30, 256, %s613_s8, [#allocation4], %s503_s10, %s503_s10, %s504_s11  }
 0x242   :  { %499 = dma.done.wait [#allocation4], 256  }
 0x243   :  { %500 = vsyncadd [#allocation4], 4294967040 }
 0x244   :  { %336 = vsyncpa [#allocation3], 1 }
 0x245   :  { %337 = vsyncpa [#allocation6], 1 }
 0x246   :  { %338 = vsyncpa [#allocation9], 1 }
 0x247   :  { %339 = vsyncpa [#allocation4], 1 }

</bundles_post_ra>
